<compile_context>
chip_gen: v7x
topology: tpu7x:2x2x1
jax: 0.10.0
libtpu: 0.0.40
codegen_flags: <defaults>
</compile_context>

<pallas_src>
import functools
import math

import jax
import jax.numpy as jnp
from jax import lax
from jax.experimental import pallas as pl
from jax.experimental.pallas import tpu as pltpu


# ----------------------------- numerics switches ------------------------------

# Exact erf GELU matches the PyTorch reference.  Set True to use the tanh
# approximation (EUP slot) if profiling shows VALU saturation on v6e/v7x.
_GELU_TANH_APPROX = False
# approx=True softmax reciprocal uses the EUP vrcp (covered by the 2e-2 test
# tolerance).  Set True for an exact f32 divide.
_SOFTMAX_EXACT_RECIP = False


@functools.lru_cache(maxsize=None)
def _vmem_limit_bytes():
    """Generation-aware scoped-VMEM limit: ~5/8 of physical, capped at 64 MiB.

    v7x (64 MiB physical per TC) -> 40 MiB; v5e/v6e (128 MiB) -> 64 MiB.
    """
    try:
        cap = int(pltpu.get_tpu_info().vmem_capacity_bytes)
    except Exception:  # API unavailable / not on TPU: conservative default
        cap = 64 * 1024 * 1024
    return max(32 * 1024 * 1024, min(cap * 5 // 8, 64 * 1024 * 1024))


# ----------------------------- kernel helpers ---------------------------------


def _layernorm(x, w, b, eps=1e-5):
    # Single pass: mean and E[x^2] together, var = E[x^2] - mu^2.
    mu = jnp.mean(x, axis=-1, keepdims=True)
    ex2 = jnp.mean(x * x, axis=-1, keepdims=True)
    var = ex2 - mu * mu
    return (x - mu) * lax.rsqrt(var + eps) * w + b


def _gelu(x):
    if _GELU_TANH_APPROX:
        return jax.nn.gelu(x, approximate=True)
    return x * 0.5 * (1.0 + lax.erf(x / math.sqrt(2.0)))


# ----------------------------- kernels -----------------------------------------


def linear_kernel(x_ref, w_ref, b_ref, o_ref):
    # y = x @ W + b ; x f32 (tm, K) cast to bf16 in-kernel (hidden under the
    # matmul, avoids a separate XLA cast pass over HBM), W bf16 (K, O)
    # pre-transposed, b f32 (1, O).
    o_ref[...] = (
        jnp.dot(x_ref[...].astype(jnp.bfloat16), w_ref[...],
                preferred_element_type=jnp.float32)
        + b_ref[...]
    )


def block_kernel(
    x_ref, ln1w_ref, ln1b_ref, wqkv_ref, wproj_ref, bproj_ref,
    ln2w_ref, ln2b_ref, w1_ref, b1_ref, w2_ref, b2_ref,
    o_ref, oheads_scr, *, num_heads, scale, n_real,
):
    f32 = jnp.float32
    bf16 = jnp.bfloat16

    x = x_ref[0]                     # (Np, D) f32 -- one batch element per step
    Np, D = x.shape
    hd = D // num_heads

    # ---- attention branch ------------------------------------------------------
    xn = _layernorm(x, ln1w_ref[...], ln1b_ref[...]).astype(bf16)
    # single big qkv projection (bf16 in, f32 accumulate), weights already (D, 3D)
    qkv = jnp.dot(xn, wqkv_ref[...], preferred_element_type=f32)     # (Np, 3D)
    q = qkv[:, 0:D] * scale          # fold scale into q (N*D instead of N^2/head)
    k = qkv[:, D:2 * D]
    v = qkv[:, 2 * D:3 * D]

    if n_real < Np:                  # mask padded key columns
        col = lax.broadcasted_iota(jnp.int32, (1, Np), 1)
        pad_bias = jnp.where(col >= n_real, f32(-1e9), f32(0.0))     # (1, Np)
    else:
        pad_bias = None

    # Per-head attention; each head's output lands in its column slot of a
    # (Np, D) VMEM scratch so the output projection is ONE full-depth
    # (Np,D)@(D,D) matmul instead of H under-filled K=hd matmuls.
    # TODO(synk): optionally zero-pad hd up to 128 in prepare_params so the
    # per-head q/k/v lane slices are also 128-aligned (biggest win on v5e).
    for h in range(num_heads):
        qh = q[:, h * hd:(h + 1) * hd].astype(bf16)
        kh = k[:, h * hd:(h + 1) * hd].astype(bf16)
        vh = v[:, h * hd:(h + 1) * hd].astype(bf16)
        # (Np, Np) = qh @ kh^T
        s = lax.dot_general(
            qh, kh, (((1,), (1,)), ((), ())), preferred_element_type=f32)
        if pad_bias is not None:
            s = s + pad_bias
        s = s - jnp.max(s, axis=-1, keepdims=True)
        p = jnp.exp(s)
        denom = jnp.sum(p, axis=-1, keepdims=True)
        if _SOFTMAX_EXACT_RECIP:
            p = p / denom
        else:
            p = p * pl.reciprocal(denom, approx=True)
        oheads_scr[:, h * hd:(h + 1) * hd] = jnp.dot(
            p.astype(bf16), vh, preferred_element_type=f32)          # (Np, hd)

    proj = jnp.dot(oheads_scr[...].astype(bf16), wproj_ref[...],
                   preferred_element_type=f32)                       # (Np, D)
    x = x + proj + bproj_ref[...]

    # ---- MLP branch --------------------------------------------------------------
    xn2 = _layernorm(x, ln2w_ref[...], ln2b_ref[...]).astype(bf16)
    h1 = jnp.dot(xn2, w1_ref[...], preferred_element_type=f32) + b1_ref[...]
    h1 = _gelu(h1)
    h2 = jnp.dot(h1.astype(bf16), w2_ref[...], preferred_element_type=f32) + b2_ref[...]
    o_ref[0] = x + h2


# ----------------------------- wrappers -----------------------------------------


def pallas_linear(x, w_t, b=None):
    """y = x @ w_t (+ b); x: (M, K) f32, w_t: (K, O) bf16 pre-transposed."""
    M, K = x.shape
    O = w_t.shape[1]
    b2d = (jnp.zeros((1, O), jnp.float32) if b is None
           else b.reshape(1, O).astype(jnp.float32))

    # Row tiling: biggest clean tile that divides M (fewer grid steps / less
    # per-step overhead), else whole M.
    tm = M
    for cand in (2048, 1024, 512, 256, 128):
        if M % cand == 0:
            tm = cand
            break

    return pl.pallas_call(
        linear_kernel,
        out_shape=jax.ShapeDtypeStruct((M, O), jnp.float32),
        grid=(M // tm,),
        in_specs=[
            pl.BlockSpec((tm, K), lambda i: (i, 0)),   # activations, row tiled
            pl.BlockSpec((K, O), lambda i: (0, 0)),    # weight, resident
            pl.BlockSpec((1, O), lambda i: (0, 0)),    # bias, resident
        ],
        out_specs=pl.BlockSpec((tm, O), lambda i: (i, 0)),
        compiler_params=pltpu.CompilerParams(
            dimension_semantics=("parallel",),
            vmem_limit_bytes=_vmem_limit_bytes(),
        ),
    )(x, w_t, b2d)


def pallas_block(x, bp, num_heads, n_real):
    bs, Np, D = x.shape
    Hm = bp["w1_t"].shape[1]
    hd = D // num_heads
    scale = hd ** (-0.5)

    def const2(shape):
        # Constant-index (resident) operand.
        # TODO(synk): pipeline_mode=pl.Buffered(1) would drop the redundant
        # second buffer for these constant blocks; left at the default until
        # single-buffering of top-level pallas_call operands is verified.
        return pl.BlockSpec(shape, lambda b: (0, 0))

    kernel = functools.partial(
        block_kernel, num_heads=num_heads, scale=scale, n_real=n_real)

    # TODO(synk): with bs < 4 the "parallel" batch grid gives v7x's two
    # TensorCores at most one step each (no software pipelining); a second
    # parallel axis over Np rows for the LN/MLP portion would help tiny batches.
    return pl.pallas_call(
        kernel,
        out_shape=jax.ShapeDtypeStruct((bs, Np, D), jnp.float32),
        grid=(bs,),
        in_specs=[
            pl.BlockSpec((1, Np, D), lambda b: (b, 0, 0)),   # x
            const2((1, D)), const2((1, D)),                  # ln1 w, b
            const2((D, 3 * D)),                              # Wqkv^T (bf16)
            const2((D, D)),                                  # Wproj^T (bf16)
            const2((1, D)),                                  # bproj
            const2((1, D)), const2((1, D)),                  # ln2 w, b
            const2((D, Hm)), const2((1, Hm)),                # fc1 (bf16 W)
            const2((Hm, D)), const2((1, D)),                 # fc2 (bf16 W)
        ],
        out_specs=pl.BlockSpec((1, Np, D), lambda b: (b, 0, 0)),
        scratch_shapes=[pltpu.VMEM((Np, D), jnp.float32)],   # per-head outputs
        compiler_params=pltpu.CompilerParams(
            dimension_semantics=("parallel",),
            vmem_limit_bytes=_vmem_limit_bytes(),
        ),
    )(
        x, bp["ln1_w"], bp["ln1_b"], bp["wqkv_t"], bp["wproj_t"], bp["bproj"],
        bp["ln2_w"], bp["ln2_b"], bp["w1_t"], bp["b1"], bp["w2_t"], bp["b2"],
    )


def transformer_forward(dparams, cfg, fmap, epoch=0):
    # `epoch` is unused: is_mask=False in the reference module.
    bs = fmap.shape[0]
    T, Dtok, D = cfg["input_tokens"], cfg["token_dim"], cfg["embed_dim"]
    H = cfg["num_heads"]

    z = fmap.reshape(-1, Dtok)                                    # (bs*T, token_dim)
    x = pallas_linear(z, dparams["l1_w_t"], dparams["l1_b"])      # (bs*T, D) f32
    x = x.reshape(bs, T, D)
    cls = jnp.broadcast_to(dparams["cls_embed"], (bs, 2, D))
    x = jnp.concatenate([cls, x], axis=1) + dparams["pos_embed"]  # (bs, T+2, D)

    n_real = T + 2
    # Pad N to a multiple of 16 so bf16 (16,128)-tiled operands are sublane
    # aligned; padded key columns are masked inside every block and padded
    # rows are sliced off below, so semantics match the unpadded reference.
    n_pad = ((n_real + 15) // 16) * 16
    if n_pad != n_real:
        x = jnp.pad(x, ((0, 0), (0, n_pad - n_real), (0, 0)))

    for bp in dparams["blocks"]:
        x = pallas_block(x, bp, H, n_real)

    # Tiny fused classification heads (D x (1+n_cls)) as a plain XLA matmul:
    # a pallas_call here is pure launch overhead + 21-lane masked stores.
    x_cls = x[:, 0, :]                                            # (bs, D)
    head = x_cls @ dparams["head_w"]                              # (bs, 1+n_cls) f32
    res_x2 = head[:, 0:1]                                         # (bs, 1)
    res_x3 = head[:, 1:]                                          # (bs, n_cls)
    x_res = x[:, 2:n_real, :]                                     # (bs, T, D)
    return res_x2, res_x3, x_res


# ------------------------- param preparation ------------------------------------


def prepare_params(params, num_heads):
    """Pre-transpose weights to (in, out) layout; matmul weights to bf16."""
    del num_heads  # head split happens in-kernel now (full-depth projection)
    out = {
        "l1_w_t": params["l1_w"].T.astype(jnp.bfloat16),           # (Dtok, D)
        "l1_b": params["l1_b"],
        "pos_embed": params["pos_embed"],
        "cls_embed": params["cls_embed"],
        # fused classification heads, kept f32 (computed in XLA): (D, 1+n_cls)
        "head_w": jnp.concatenate(
            [params["l2_w"], params["l3_w"]], axis=0).T.astype(jnp.float32),
        "blocks": [],
    }
    for bp in params["blocks"]:
        out["blocks"].append(dict(
            ln1_w=bp["ln1_w"], ln1_b=bp["ln1_b"],
            wqkv_t=bp["wqkv"].T.astype(jnp.bfloat16),              # (D, 3D)
            wproj_t=bp["wproj"].T.astype(jnp.bfloat16),            # (D, D)
            bproj=bp["bproj"],
            ln2_w=bp["ln2_w"], ln2_b=bp["ln2_b"],
            w1_t=bp["w1"].T.astype(jnp.bfloat16),                  # (D, Hm)
            b1=bp["b1"],
            w2_t=bp["w2"].T.astype(jnp.bfloat16),                  # (Hm, D)
            b2=bp["b2"],
        ))
    return out


# ------------------------- pure-JAX f32 reference --------------------------------


def ref_forward(params, cfg, fmap, epoch=0):
    bs = fmap.shape[0]
    T, Dtok, D = cfg["input_tokens"], cfg["token_dim"], cfg["embed_dim"]
    H = cfg["num_heads"]
    hd = D // H
    scale = hd ** (-0.5)

    def ln(x, w, b, eps=1e-5):
        mu = jnp.mean(x, axis=-1, keepdims=True)
        var = jnp.mean((x - mu) ** 2, axis=-1, keepdims=True)
        return (x - mu) / jnp.sqrt(var + eps) * w + b

    z = fmap.reshape(-1, Dtok)
    x = (z @ params["l1_w"].T + params["l1_b"]).reshape(bs, T, D)
    cls = jnp.broadcast_to(params["cls_embed"], (bs, 2, D))
    x = jnp.concatenate([cls, x], axis=1) + params["pos_embed"]

    for bp in params["blocks"]:
        xn = ln(x, bp["ln1_w"], bp["ln1_b"])
        qkv = xn @ bp["wqkv"].T                                  # (bs, N, 3D)
        N = x.shape[1]
        qkv = qkv.reshape(bs, N, 3, H, hd).transpose(2, 0, 3, 1, 4)
        q, k, v = qkv[0], qkv[1], qkv[2]                         # (bs, H, N, hd)
        attn = jnp.einsum("bhnd,bhmd->bhnm", q, k) * scale
        attn = jax.nn.softmax(attn, axis=-1)
        o = jnp.einsum("bhnm,bhmd->bhnd", attn, v)
        o = o.transpose(0, 2, 1, 3).reshape(bs, N, D)
        o = o @ bp["wproj"].T + bp["bproj"]
        x = x + o
        xn2 = ln(x, bp["ln2_w"], bp["ln2_b"])
        h1 = xn2 @ bp["w1"].T + bp["b1"]
        h1 = h1 * 0.5 * (1.0 + lax.erf(h1 / math.sqrt(2.0)))
        x = x + (h1 @ bp["w2"].T + bp["b2"])

    x_cls = x[:, 0, :]
    return x_cls @ params["l2_w"].T, x_cls @ params["l3_w"].T, x[:, 2:, :]


# ------------------------------ init ----------------------------------------------


def init_params(key, cfg):
    T, Dtok, D = cfg["input_tokens"], cfg["token_dim"], cfg["embed_dim"]
    n_cls, depth = cfg["n_cls"], cfg["depth"]
    H_mlp = int(D * cfg["mlp_ratio"])

    def nrm(k, shape, std=0.02):
        return (std * jax.random.normal(k, shape)).astype(jnp.float32)

    keys = iter(jax.random.split(key, 16 + 8 * depth))
    params = {
        "l1_w": nrm(next(keys), (D, Dtok)),
        "l1_b": jnp.zeros((D,), jnp.float32),
        "pos_embed": nrm(next(keys), (1, T + 2, D)),
        "cls_embed": nrm(next(keys), (1, 2, D)),
        "l2_w": nrm(next(keys), (1, D)),
        "l3_w": nrm(next(keys), (n_cls, D)),
        "blocks": [],
    }
    for _ in range(depth):
        params["blocks"].append({
            "ln1_w": jnp.ones((1, D), jnp.float32),
            "ln1_b": jnp.zeros((1, D), jnp.float32),
            "wqkv": nrm(next(keys), (3 * D, D)),        # qkv_bias=False
            "wproj": nrm(next(keys), (D, D)),
            "bproj": jnp.zeros((1, D), jnp.float32),
            "ln2_w": jnp.ones((1, D), jnp.float32),
            "ln2_b": jnp.zeros((1, D), jnp.float32),
            "w1": nrm(next(keys), (H_mlp, D)),
            "b1": jnp.zeros((1, H_mlp), jnp.float32),
            "w2": nrm(next(keys), (D, H_mlp)),
            "b2": jnp.zeros((1, D), jnp.float32),
        })
    return params


# ------------------------------ main ----------------------------------------------

if __name__ == "__main__":
    cfg = dict(
        input_tokens=8,    # small stand-in for 512
        token_dim=64,      # small stand-in for 1024
        embed_dim=32,      # small stand-in for 384
        depth=2,           # small stand-in for 5
        n_cls=20,
        n_subspaces=10,
        num_heads=4,
        mlp_ratio=4.0,
    )

    key = jax.random.PRNGKey(0)
    kp, kx = jax.random.split(key)
    params = init_params(kp, cfg)
    dparams = prepare_params(params, cfg["num_heads"])

    bs = 2
    fmap = jax.random.normal(
        kx, (bs, cfg["input_tokens"], cfg["token_dim"]), dtype=jnp.float32
    )

    res_x2, res_x3, x_res = transformer_forward(dparams, cfg, fmap, epoch=0)
    jax.block_until_ready((res_x2, res_x3, x_res))

    # sanity check against pure-f32 JAX reference (bf16 matmuls -> relaxed tol)
    r2, r3, rr = ref_forward(params, cfg, fmap, epoch=0)
    assert res_x2.shape == (bs, 1)
    assert res_x3.shape == (bs, cfg["n_cls"])
    assert x_res.shape == (bs, cfg["input_tokens"], cfg["embed_dim"])
    assert jnp.allclose(res_x2, r2, atol=2e-2, rtol=2e-2)
    assert jnp.allclose(res_x3, r3, atol=2e-2, rtol=2e-2)
    assert jnp.allclose(x_res, rr, atol=2e-2, rtol=2e-2)

    print("KERNEL_OK")
</pallas_src>

<mosaic_0001>
module attributes {stable_mosaic.version = 11 : i64} {
  func.func @linear_kernel(%arg0: i32, %arg1: memref<16x64xf32, #tpu.memory_space<vmem>>, %arg2: memref<64x32xbf16, #tpu.memory_space<vmem>>, %arg3: memref<1x32xf32, #tpu.memory_space<vmem>>, %arg4: memref<16x32xf32, #tpu.memory_space<vmem>>) attributes {dimension_semantics = [#tpu.dimension_semantics<parallel>], iteration_bounds = array<i64: 1>, scalar_prefetch = 0 : i64, scratch_operands = 0 : i64, tpu.core_type = #tpu.core_type<tc>, window_params = [{transform_indices = @transform_0, window_bounds = array<i64: 16, 64>}, {pipeline_mode = #tpu.pipeline_mode<synchronous>, transform_indices = @transform_1, window_bounds = array<i64: 64, 32>}, {pipeline_mode = #tpu.pipeline_mode<synchronous>, transform_indices = @transform_2, window_bounds = array<i64: 1, 32>}, {transform_indices = @transform_3, window_bounds = array<i64: 16, 32>}]} {
    %c0 = arith.constant 0 : index
    %c0_0 = arith.constant 0 : index
    %0 = vector.load %arg1[%c0, %c0_0] : memref<16x64xf32, #tpu.memory_space<vmem>>, vector<16x64xf32>
    %1 = arith.truncf %0 : vector<16x64xf32> to vector<16x64xbf16>
    %c0_1 = arith.constant 0 : index
    %c0_2 = arith.constant 0 : index
    %2 = vector.load %arg2[%c0_1, %c0_2] : memref<64x32xbf16, #tpu.memory_space<vmem>>, vector<64x32xbf16>
    %cst = arith.constant dense<0.000000e+00> : vector<16x32xf32>
    %3 = tpu.matmul %1, %2, %cst {dimension_numbers = #tpu.dot_dimension_numbers<[1], [0], [0], [1], [0, 0, 1, 1], [], []>} : vector<16x64xbf16>, vector<64x32xbf16>, vector<16x32xf32> -> vector<16x32xf32>
    %c0_3 = arith.constant 0 : index
    %c0_4 = arith.constant 0 : index
    %4 = vector.load %arg3[%c0_3, %c0_4] : memref<1x32xf32, #tpu.memory_space<vmem>>, vector<1x32xf32>
    %5 = vector.broadcast %4 : vector<1x32xf32> to vector<16x32xf32>
    %6 = arith.addf %3, %5 : vector<16x32xf32>
    %c0_5 = arith.constant 0 : index
    %c0_6 = arith.constant 0 : index
    %7 = vector.load %arg4[%c0_5, %c0_6] : memref<16x32xf32, #tpu.memory_space<vmem>>, vector<16x32xf32>
    tpu.vector_store %arg4[%c0_5, %c0_6], %6 {strides = array<i32>} : memref<16x32xf32, #tpu.memory_space<vmem>>, vector<16x32xf32>,
    return
  }
  func.func @transform_0(%arg0: i32) -> (i32, i32) {
    %c0_i32 = arith.constant 0 : i32
    %c0_i32_0 = arith.constant 0 : i32
    return %arg0, %c0_i32 : i32, i32
  }
  func.func @transform_1(%arg0: i32) -> (i32, i32) {
    %c0_i32 = arith.constant 0 : i32
    %c0_i32_0 = arith.constant 0 : i32
    %c0_i32_1 = arith.constant 0 : i32
    return %c0_i32, %c0_i32_0 : i32, i32
  }
  func.func @transform_2(%arg0: i32) -> (i32, i32) {
    %c0_i32 = arith.constant 0 : i32
    %c0_i32_0 = arith.constant 0 : i32
    %c0_i32_1 = arith.constant 0 : i32
    return %c0_i32, %c0_i32_0 : i32, i32
  }
  func.func @transform_3(%arg0: i32) -> (i32, i32) {
    %c0_i32 = arith.constant 0 : i32
    %c0_i32_0 = arith.constant 0 : i32
    return %arg0, %c0_i32 : i32, i32
  }
}

</mosaic_0001>

<bundles_post_ra>
// kernel: tpu_custom_call.1
= control target key start
LH: loop header
LB: loop body
LE: loop exit
PB: predicated region body
PF: predicated region fallthrough
CT: control target
= control target key end

     0   :  { %v178_v1 = vmov 0.0   ;;  %vm179_vm0 = vmmov 0   ;;  %s236_s0 = inlined_call_operand.vmem [shape: f32[16,64], index: 0, kind: input, shape index: {}]   ;;  %s237_s1 = inlined_call_operand.vmem [shape: bf16[64,32], index: 1, kind: input, shape index: {}]   ;;  %s238_s2 = inlined_call_operand.vmem [shape: f32[1,32], index: 2, kind: input, shape index: {}]   ;;  %s239_s3 = inlined_call_operand.hbm [shape: f32[16,32], index: 3, kind: output, shape index: {}]  }
   0x1   :  { %v150_v0 = vld [vmem:[%s237_s1] sm:$0xff]   ;;  %133 = vmatprep.subr.bf16.mxu0 %v178_v1  ;;  %v151_v2 = vld [vmem:[%s237_s1 + $0x8] sm:$0xff]   ;;  %141 = vmatprep.mubr.msk.bf16.mxu0 %vm179_vm0, %v178_v1 }
   0x2   :  { %134 = vmatpush3.bf16.msra.mxu0 %v150_v0 }
   0x3   :  { %135 = vmatprep.subr.bf16.mxu0 %v178_v1 }
   0x4   :  { %8 = vsyncpa [#allocation3], 0  ;;  %v152_v3 = vld [vmem:[%s237_s1 + $0x10] sm:$0xff]   ;;  %v153_v4 = vld [vmem:[%s237_s1 + $0x18] sm:$0xff]   ;;  %vm58_vm1 = vcmask 523264   ;;  %s180_s26 = smov [#allocation2]  }
   0x5   :  { %v16_v5 = vld [vmem:[%s236_s0] sm:$0xff]  ;;  %v17_v6 = vld [vmem:[%s236_s0 + $0x8] sm:$0xff]  ;;  %s111_s27 = sshll.u32 %s180_s26, 4  ;;  %vm103_vm2 = vcmask 261120   ;;  %s112_s27 = int_to_ptr.vmem [resolvable:$true] %s111_s27 }
   0x6   :  { %136 = vmatpush3.bf16.msra.mxu0 %v151_v2  ;;  %v18_v7 = vpack.c.bf16 %v17_v6, %v16_v5  ;;  %v122_v8 = vld [vmem:[%s238_s2] ss:$0 sm:$0xff]  ;;  %s154_s0 = scalar_lea.vmem %s112_s27, 256  ;;  %p159_p1 = scmp.lt.s32.totalorder %s112_s27, %s112_s27 }
   0x7   :  { %137 = vmatprep.subr.bf16.mxu0 %v178_v1  ;;  %p155_p0 = scmp.ne.s32.totalorder %s112_s27, %s154_s0  ;;  %p160_p2 = scmp.lt.s32.totalorder %s154_s0, %s154_s0 }
   0x9   :  { %p161_p3 = por %p160_p2, %p159_p1 }
   0xa   :  { %138 = vmatpush3.bf16.msra.mxu0 %v152_v3 }
   0xb   :  { %139 = vmatprep.subr.bf16.mxu0 %v178_v1  ;;  %p162_p4 = pnand %p161_p3, %p155_p0 }
   0xe   :  { %140 = vmatpush3.bf16.msra.mxu0 %v153_v4 }
  0x11   :  { %142 = vmatmul.mubr.msk.bf16.vlgmr.msra.gmra.mrb[0].mxu0 %vm58_vm1, %v18_v7 }
  0xe4   :  { %v96_v9 = vpop.f32.mrb[0].mxu0 }
  0xe5   :  { %v97_v10 = vadd.f32 %v122_v8, %v96_v9  ;;  %v143_v11 = vpop.f32.mrb[1].mxu0 }
  0xe6   :  { %v99_v12 = vpop.f32.mrb[2].mxu0 }
  0xe7   :  { %104 = vst.msk [vmem:[#allocation2] sm:$0xff] %vm103_vm2, %v97_v10  ;;  %v100_v13 = vadd.f32 %v122_v8, %v99_v12  ;;  %v144_v14 = vpop.f32.mrb[3].mxu0 }
  0xe9   :  { %105 = vst.msk [vmem:[#allocation2 + $0x8] sm:$0xff] %vm103_vm2, %v100_v13 }
  0xea   :  { %165 = shalt.err (!%p162_p4)
}
  0xeb   :  { %s166_s28 = scalar_lea.hbm %s239_s3, 256 }
  0xec   :  { %p167_p5 = scmp.ne.s32.totalorder %s239_s3, %s166_s28  ;;  %p170_p6 = scmp.lt.u32.totalorder %s166_s28, %s239_s3 }
  0xee   :  { %p172_p7 = pnand %p170_p6, %p167_p5 }
  0xf0   :  { %175 = shalt.err (!%p172_p7)
}
  0xf1   :  { %s181_s6 = smov 128   ;;  %s182_s7 = smov 8  }
  0xf2   :  { %117 = dma.vmem_to_hbm [thread:$0]  %s112_s27, 256, %s239_s3, [#allocation3], %s181_s6, %s181_s6, %s182_s7  }
  0xf3   :  { %176 = dma.done.wait [#allocation3], 256  }
  0xf4   :  { %177 = vsyncadd [#allocation3], 4294967040 }
  0xf5   :  { %121 = vsyncpa [#allocation3], 1 }

</bundles_post_ra>
